<compile_context>
chip_gen: v7x
topology: tpu7x:2x2x1
jax: 0.10.0
libtpu: 0.0.40
codegen_flags: <defaults>
</compile_context>

<pallas_src>
import functools

import jax
import jax.numpy as jnp
from jax.experimental import pallas as pl
from jax.experimental.pallas import tpu as pltpu


# ----------------------------------------------------------------------------
# Fused kernel: 3x (Linear + ReLU) on the MXU, then a numerically stable
# softmax over each action's lane-aligned atom slab.
# ----------------------------------------------------------------------------
def _fused_mlp_softmax_kernel(x_ref, w1_ref, b1_ref, w2_ref, b2_ref,
                              w3_ref, b3_ref, o_ref, *,
                              num_actions, num_atoms, atoms_p):
    x = x_ref[...]
    h1 = jnp.dot(x.astype(w1_ref.dtype), w1_ref[...],
                 preferred_element_type=jnp.float32) + b1_ref[...]
    h1 = jnp.maximum(h1, 0.0)
    h2 = jnp.dot(h1.astype(w2_ref.dtype), w2_ref[...],
                 preferred_element_type=jnp.float32) + b2_ref[...]
    h2 = jnp.maximum(h2, 0.0)
    h3 = jnp.dot(h2.astype(w3_ref.dtype), w3_ref[...],
                 preferred_element_type=jnp.float32) + b3_ref[...]
    h3 = jnp.maximum(h3, 0.0)          # NOTE: the reference module ReLUs linear3 too

    # One (1, atoms_p) validity mask, hoisted out of the per-action loop.
    padded = atoms_p != num_atoms
    if padded:
        lane = jax.lax.broadcasted_iota(jnp.int32, (1, atoms_p), 1)
        valid = lane < num_atoms

    # Per-action softmax on lane-aligned static slices.  Padded lanes of h3
    # are exactly 0 (zero-padded W3 columns / b3 entries) and real lanes are
    # >= 0 after the ReLU, so the group max needs no mask; only the sum does.
    for a in range(num_actions):
        lo = a * atoms_p
        g = h3[:, lo:lo + atoms_p]                       # (tile_b, atoms_p)
        gmax = jnp.max(g, axis=-1, keepdims=True)
        e = jnp.exp(g - gmax)
        if padded:
            s = jnp.sum(jnp.where(valid, e, 0.0), axis=-1, keepdims=True)
        else:
            s = jnp.sum(e, axis=-1, keepdims=True)
        inv = 1.0 / s                                    # exact; (tile_b, 1) only
        o_ref[:, lo:lo + atoms_p] = (e * inv).astype(o_ref.dtype)


# ----------------------------------------------------------------------------
# VMEM budgeting / tile-size helpers.
# ----------------------------------------------------------------------------
_FALLBACK_VMEM_BUDGET = 40 * 1024 * 1024       # v7x-safe (64 MiB physical)


def _vmem_budget_bytes():
    """~70% of physical VMEM: ~45 MiB on v7x, ~90 MiB on v5e/v6e."""
    try:
        info = pltpu.get_tpu_info()
        cap = int(getattr(info, "vmem_capacity_bytes", 0) or 0)
        if cap <= 0:
            return _FALLBACK_VMEM_BUDGET
        return min(int(cap * 0.7), 100 * 1024 * 1024)
    except Exception:
        return _FALLBACK_VMEM_BUDGET


def _vmem_bytes_estimate(tile_b, num_inputs, h4, hidden, out_dim_p, in_bytes):
    f32 = 4
    # Pallas double-buffers EVERY input block by default, including the
    # grid-invariant weights/biases -> count them twice.
    weights = 2 * (num_inputs * h4 + h4 * hidden + hidden * out_dim_p) * in_bytes
    biases = 2 * (h4 + hidden + out_dim_p) * f32
    io = 2 * tile_b * (num_inputs * in_bytes + out_dim_p * f32)   # x / out tiles
    temps = tile_b * (h4 + hidden + 3 * out_dim_p) * f32          # h1/h2/h3 + exp temps
    return weights + biases + io + temps


def _pick_tile_b(B, num_inputs, h4, hidden, out_dim_p, budget, *, align, in_bytes):
    cap = 1024 if budget >= (64 << 20) else 512     # taller tiles on 128 MiB parts
    tile = min(B, cap)
    # Keep >= 2 grid steps when the whole batch would fit in one tile so the
    # "parallel" batch axis can shard across v7x's two TensorCores
    # (one extra ~0.35 us grid step elsewhere -> negligible).
    if tile == B and B >= 2 * align:
        half = (((B + 1) // 2) + align - 1) // align * align
        if half < B:
            tile = half
    if tile < B:
        tile = max(align, (tile // align) * align)
    while tile > align and _vmem_bytes_estimate(
            tile, num_inputs, h4, hidden, out_dim_p, in_bytes) > budget:
        tile = max(align, (tile // 2 // align) * align)
    return tile


# ----------------------------------------------------------------------------
# Public wrapper.
# ----------------------------------------------------------------------------
@functools.partial(jax.jit,
                   static_argnames=("num_actions", "num_atoms", "tile_b", "mxu_bf16"))
def categorical_dqn_forward(x, params, *, num_actions, num_atoms,
                            tile_b=None, mxu_bf16=False):
    """x: (B, num_inputs) float32 -> (B, num_actions, num_atoms) float32."""
    w1t, b1, w2t, b2, w3t, b3 = params
    B, num_inputs = x.shape
    h4 = w1t.shape[1]
    hidden = w2t.shape[1]
    out_dim = num_actions * num_atoms
    assert w3t.shape[1] == out_dim

    # Per-action lane padding: each action's atom group gets its own
    # 128-multiple lane slab, so output stores are unmasked & lane-dense and
    # the in-kernel group softmax works on lane-aligned static slices.
    atoms_p = ((num_atoms + 127) // 128) * 128
    out_dim_p = num_actions * atoms_p
    if atoms_p != num_atoms:
        pad = atoms_p - num_atoms
        w3t = jnp.pad(w3t.reshape(hidden, num_actions, num_atoms),
                      ((0, 0), (0, 0), (0, pad))).reshape(hidden, out_dim_p)
        b3 = jnp.pad(b3.reshape(1, num_actions, num_atoms),
                     ((0, 0), (0, 0), (0, pad))).reshape(1, out_dim_p)

    if mxu_bf16:
        # bf16 MXU operands, f32 accumulation (full MXU rate on v6e/v7x,
        # halves resident-weight VMEM).  Default off for f32 reference parity.
        x = x.astype(jnp.bfloat16)
        w1t = w1t.astype(jnp.bfloat16)
        w2t = w2t.astype(jnp.bfloat16)
        w3t = w3t.astype(jnp.bfloat16)
    in_bytes = 2 if mxu_bf16 else 4
    align = 16 if mxu_bf16 else 8          # bf16 packs 16 rows per sublane

    budget = _vmem_budget_bytes()
    if tile_b is None:
        tile_b = _pick_tile_b(B, num_inputs, h4, hidden, out_dim_p, budget,
                              align=align, in_bytes=in_bytes)
    tile_b = min(tile_b, B)
    if tile_b < B:
        tile_b = max(align, (tile_b // align) * align)
    grid = (pl.cdiv(B, tile_b),)

    est = _vmem_bytes_estimate(tile_b, num_inputs, h4, hidden, out_dim_p, in_bytes)
    vmem_limit = int(min(max(2 * est, 16 * 1024 * 1024), budget))

    # Advisory cost hint for XLA's scheduler around the custom call.
    flops = 2 * B * (num_inputs * h4 + h4 * hidden + hidden * out_dim_p)
    bytes_accessed = (B * num_inputs * in_bytes + B * out_dim_p * 4
                      + (num_inputs * h4 + h4 * hidden + hidden * out_dim_p) * in_bytes
                      + (h4 + hidden + out_dim_p) * 4)
    cost = pl.CostEstimate(flops=flops, transcendentals=B * out_dim_p,
                           bytes_accessed=bytes_accessed)

    kernel = functools.partial(_fused_mlp_softmax_kernel,
                               num_actions=num_actions, num_atoms=num_atoms,
                               atoms_p=atoms_p)

    batch_tile = lambda i: (i, 0)   # x / out tiles move with the grid
    resident = lambda i: (0, 0)     # weights & biases stay put in VMEM

    probs_p = pl.pallas_call(
        kernel,
        out_shape=jax.ShapeDtypeStruct((B, out_dim_p), jnp.float32),
        grid=grid,
        in_specs=[
            pl.BlockSpec((tile_b, num_inputs), batch_tile),
            pl.BlockSpec(w1t.shape, resident),
            pl.BlockSpec(b1.shape, resident),
            pl.BlockSpec(w2t.shape, resident),
            pl.BlockSpec(b2.shape, resident),
            pl.BlockSpec(w3t.shape, resident),
            pl.BlockSpec(b3.shape, resident),
        ],
        out_specs=pl.BlockSpec((tile_b, out_dim_p), batch_tile),
        compiler_params=pltpu.CompilerParams(
            dimension_semantics=("parallel",),   # shard batch tiles over v7x's 2 TCs
            vmem_limit_bytes=vmem_limit,
        ),
        cost_estimate=cost,
    )(x, w1t, b1, w2t, b2, w3t, b3)

    # Drop the per-action lane padding; expose the (B, A, atoms) view.
    return probs_p.reshape(B, num_actions, atoms_p)[:, :, :num_atoms]


# ----------------------------------------------------------------------------
# Params / reference.
# ----------------------------------------------------------------------------
def init_params(key, num_inputs, num_actions, num_atoms, hidden_size):
    """Deterministic init matching nn.Linear shapes (U(-1/sqrt(fan_in), +))."""
    h4 = hidden_size // 4
    out_dim = num_actions * num_atoms
    ks = jax.random.split(key, 6)

    def linear(kw, kb, fan_in, fan_out):
        bound = 1.0 / jnp.sqrt(fan_in)
        w = jax.random.uniform(kw, (fan_out, fan_in), jnp.float32, -bound, bound)
        b = jax.random.uniform(kb, (fan_out,), jnp.float32, -bound, bound)
        # pre-transposed weight; bias kept as a (1, fan_out) VMEM row
        return w.T, b.reshape(1, fan_out)

    w1t, b1 = linear(ks[0], ks[1], num_inputs, h4)
    w2t, b2 = linear(ks[2], ks[3], h4, hidden_size)
    w3t, b3 = linear(ks[4], ks[5], hidden_size, out_dim)
    return (w1t, b1, w2t, b2, w3t, b3)


def reference_forward(x, params, num_actions, num_atoms):
    w1t, b1, w2t, b2, w3t, b3 = params
    h1 = jax.nn.relu(x @ w1t + b1)
    h2 = jax.nn.relu(h1 @ w2t + b2)
    h3 = jax.nn.relu(h2 @ w3t + b3)
    p = jax.nn.softmax(h3.reshape(-1, num_atoms), axis=1)
    return p.reshape(-1, num_actions, num_atoms)


if __name__ == "__main__":
    # small shapes consistent with the module
    batch = 2
    num_inputs = 16
    num_actions = 4
    num_atoms = 8          # args.atom
    hidden_size = 32       # args.hidden_size  (hidden // 4 = 8)

    key = jax.random.PRNGKey(0)
    k_x, k_p, k_x2 = jax.random.split(key, 3)
    params = init_params(k_p, num_inputs, num_actions, num_atoms, hidden_size)

    # --- toy batch (single grid step) ---
    x = jax.random.normal(k_x, (batch, num_inputs), dtype=jnp.float32)
    out = categorical_dqn_forward(
        x, params, num_actions=num_actions, num_atoms=num_atoms)
    out = jax.block_until_ready(out)

    ref = reference_forward(x, params, num_actions, num_atoms)
    assert out.shape == (batch, num_actions, num_atoms)
    # matmul precision differences vs XLA reference -> compare at ~1e-3
    assert jnp.allclose(out, ref, atol=2e-3, rtol=2e-3)
    # exact normalization in-kernel -> row sums tight
    assert jnp.allclose(jnp.sum(out, axis=-1), 1.0, atol=1e-4)

    # --- auto-picked tiles: 48 rows -> split into >=2 grid steps (v7x rule) ---
    x2 = jax.random.normal(k_x2, (48, num_inputs), dtype=jnp.float32)
    out_auto = categorical_dqn_forward(
        x2, params, num_actions=num_actions, num_atoms=num_atoms)
    out_auto = jax.block_until_ready(out_auto)
    ref2 = reference_forward(x2, params, num_actions, num_atoms)
    assert jnp.allclose(out_auto, ref2, atol=2e-3, rtol=2e-3)

    # --- explicit small tiles: exercise the 3-step batch-tiled grid path ---
    out2 = categorical_dqn_forward(
        x2, params, num_actions=num_actions, num_atoms=num_atoms, tile_b=16)
    out2 = jax.block_until_ready(out2)
    assert jnp.allclose(out2, ref2, atol=2e-3, rtol=2e-3)
    assert jnp.allclose(jnp.sum(out2, axis=-1), 1.0, atol=1e-4)

    print("KERNEL_OK")
</pallas_src>

<mosaic_0001>
module attributes {stable_mosaic.version = 11 : i64} {
  func.func @_fused_mlp_softmax_kernel(%arg0: i32, %arg1: memref<2x16xf32, #tpu.memory_space<vmem>>, %arg2: memref<16x8xf32, #tpu.memory_space<vmem>>, %arg3: memref<1x8xf32, #tpu.memory_space<vmem>>, %arg4: memref<8x32xf32, #tpu.memory_space<vmem>>, %arg5: memref<1x32xf32, #tpu.memory_space<vmem>>, %arg6: memref<32x512xf32, #tpu.memory_space<vmem>>, %arg7: memref<1x512xf32, #tpu.memory_space<vmem>>, %arg8: memref<2x512xf32, #tpu.memory_space<vmem>>) attributes {dimension_semantics = [#tpu.dimension_semantics<parallel>], iteration_bounds = array<i64: 1>, scalar_prefetch = 0 : i64, scratch_operands = 0 : i64, tpu.core_type = #tpu.core_type<tc>, window_params = [{transform_indices = @transform_0, window_bounds = array<i64: 2, 16>}, {pipeline_mode = #tpu.pipeline_mode<synchronous>, transform_indices = @transform_1, window_bounds = array<i64: 16, 8>}, {pipeline_mode = #tpu.pipeline_mode<synchronous>, transform_indices = @transform_2, window_bounds = array<i64: 1, 8>}, {pipeline_mode = #tpu.pipeline_mode<synchronous>, transform_indices = @transform_3, window_bounds = array<i64: 8, 32>}, {pipeline_mode = #tpu.pipeline_mode<synchronous>, transform_indices = @transform_4, window_bounds = array<i64: 1, 32>}, {pipeline_mode = #tpu.pipeline_mode<synchronous>, transform_indices = @transform_5, window_bounds = array<i64: 32, 512>}, {pipeline_mode = #tpu.pipeline_mode<synchronous>, transform_indices = @transform_6, window_bounds = array<i64: 1, 512>}, {transform_indices = @transform_7, window_bounds = array<i64: 2, 512>}]} {
    %c0 = arith.constant 0 : index
    %c0_0 = arith.constant 0 : index
    %0 = vector.load %arg1[%c0, %c0_0] : memref<2x16xf32, #tpu.memory_space<vmem>>, vector<2x16xf32>
    %c0_1 = arith.constant 0 : index
    %c0_2 = arith.constant 0 : index
    %1 = vector.load %arg2[%c0_1, %c0_2] : memref<16x8xf32, #tpu.memory_space<vmem>>, vector<16x8xf32>
    %cst = arith.constant dense<0.000000e+00> : vector<2x8xf32>
    %2 = tpu.matmul %0, %1, %cst {dimension_numbers = #tpu.dot_dimension_numbers<[1], [0], [0], [1], [0, 0, 1, 1], [], []>} : vector<2x16xf32>, vector<16x8xf32>, vector<2x8xf32> -> vector<2x8xf32>
    %c0_3 = arith.constant 0 : index
    %c0_4 = arith.constant 0 : index
    %3 = vector.load %arg3[%c0_3, %c0_4] : memref<1x8xf32, #tpu.memory_space<vmem>>, vector<1x8xf32>
    %4 = vector.broadcast %3 : vector<1x8xf32> to vector<2x8xf32>
    %5 = arith.addf %2, %4 : vector<2x8xf32>
    %cst_5 = arith.constant 0.000000e+00 : f32
    %6 = vector.broadcast %cst_5 : f32 to vector<2x8xf32>
    %7 = arith.maximumf %5, %6 : vector<2x8xf32>
    %c0_6 = arith.constant 0 : index
    %c0_7 = arith.constant 0 : index
    %8 = vector.load %arg4[%c0_6, %c0_7] : memref<8x32xf32, #tpu.memory_space<vmem>>, vector<8x32xf32>
    %cst_8 = arith.constant dense<0.000000e+00> : vector<2x32xf32>
    %9 = tpu.matmul %7, %8, %cst_8 {dimension_numbers = #tpu.dot_dimension_numbers<[1], [0], [0], [1], [0, 0, 1, 1], [], []>} : vector<2x8xf32>, vector<8x32xf32>, vector<2x32xf32> -> vector<2x32xf32>
    %c0_9 = arith.constant 0 : index
    %c0_10 = arith.constant 0 : index
    %10 = vector.load %arg5[%c0_9, %c0_10] : memref<1x32xf32, #tpu.memory_space<vmem>>, vector<1x32xf32>
    %11 = vector.broadcast %10 : vector<1x32xf32> to vector<2x32xf32>
    %12 = arith.addf %9, %11 : vector<2x32xf32>
    %cst_11 = arith.constant 0.000000e+00 : f32
    %13 = vector.broadcast %cst_11 : f32 to vector<2x32xf32>
    %14 = arith.maximumf %12, %13 : vector<2x32xf32>
    %c0_12 = arith.constant 0 : index
    %c0_13 = arith.constant 0 : index
    %15 = vector.load %arg6[%c0_12, %c0_13] : memref<32x512xf32, #tpu.memory_space<vmem>>, vector<32x512xf32>
    %cst_14 = arith.constant dense<0.000000e+00> : vector<2x512xf32>
    %16 = tpu.matmul %14, %15, %cst_14 {dimension_numbers = #tpu.dot_dimension_numbers<[1], [0], [0], [1], [0, 0, 1, 1], [], []>} : vector<2x32xf32>, vector<32x512xf32>, vector<2x512xf32> -> vector<2x512xf32>
    %c0_15 = arith.constant 0 : index
    %c0_16 = arith.constant 0 : index
    %17 = vector.load %arg7[%c0_15, %c0_16] : memref<1x512xf32, #tpu.memory_space<vmem>>, vector<1x512xf32>
    %18 = vector.broadcast %17 : vector<1x512xf32> to vector<2x512xf32>
    %19 = arith.addf %16, %18 : vector<2x512xf32>
    %cst_17 = arith.constant 0.000000e+00 : f32
    %20 = vector.broadcast %cst_17 : f32 to vector<2x512xf32>
    %21 = arith.maximumf %19, %20 : vector<2x512xf32>
    %22 = tpu.iota {dimensions = array<i32: 1>} : vector<1x128xi32>
    %c8_i32 = arith.constant 8 : i32
    %23 = vector.broadcast %c8_i32 : i32 to vector<1x128xi32>
    %24 = arith.cmpi slt, %22, %23 : vector<1x128xi32>
    %25 = vector.extract_strided_slice %21 {offsets = [0, 0], sizes = [2, 128], strides = [1, 1]} : vector<2x512xf32> to vector<2x128xf32>
    %cst_18 = arith.constant dense<0xFF800000> : vector<2xf32>
    %26 = vector.multi_reduction <maximumf>, %25, %cst_18 [1] : vector<2x128xf32> to vector<2xf32>
    %27 = vector.shape_cast %26 : vector<2xf32> to vector<2x1xf32>
    %28 = vector.broadcast %27 : vector<2x1xf32> to vector<2x128xf32>
    %29 = arith.subf %25, %28 : vector<2x128xf32>
    %30 = math.exp %29 : vector<2x128xf32>
    %cst_19 = arith.constant 0.000000e+00 : f32
    %31 = vector.shape_cast %24 : vector<1x128xi1> to vector<1x128xi1>
    %32 = vector.broadcast %31 : vector<1x128xi1> to vector<2x128xi1>
    %33 = vector.broadcast %cst_19 : f32 to vector<2x128xf32>
    %34 = arith.select %32, %30, %33 : vector<2x128xi1>, vector<2x128xf32>
    %cst_20 = arith.constant dense<0.000000e+00> : vector<2xf32>
    %35 = vector.multi_reduction <add>, %34, %cst_20 [1] : vector<2x128xf32> to vector<2xf32>
    %36 = vector.shape_cast %35 : vector<2xf32> to vector<2x1xf32>
    %cst_21 = arith.constant 1.000000e+00 : f32
    %37 = vector.broadcast %cst_21 : f32 to vector<2x1xf32>
    %38 = arith.divf %37, %36 : vector<2x1xf32>
    %39 = vector.broadcast %38 : vector<2x1xf32> to vector<2x128xf32>
    %40 = arith.mulf %30, %39 : vector<2x128xf32>
    %c0_22 = arith.constant 0 : index
    %c0_23 = arith.constant 0 : index
    %41 = vector.load %arg8[%c0_22, %c0_23] : memref<2x512xf32, #tpu.memory_space<vmem>>, vector<2x128xf32>
    tpu.vector_store %arg8[%c0_22, %c0_23], %40 {strides = array<i32>} : memref<2x512xf32, #tpu.memory_space<vmem>>, vector<2x128xf32>,
    %42 = vector.extract_strided_slice %21 {offsets = [0, 128], sizes = [2, 128], strides = [1, 1]} : vector<2x512xf32> to vector<2x128xf32>
    %cst_24 = arith.constant dense<0xFF800000> : vector<2xf32>
    %43 = vector.multi_reduction <maximumf>, %42, %cst_24 [1] : vector<2x128xf32> to vector<2xf32>
    %44 = vector.shape_cast %43 : vector<2xf32> to vector<2x1xf32>
    %45 = vector.broadcast %44 : vector<2x1xf32> to vector<2x128xf32>
    %46 = arith.subf %42, %45 : vector<2x128xf32>
    %47 = math.exp %46 : vector<2x128xf32>
    %cst_25 = arith.constant 0.000000e+00 : f32
    %48 = vector.shape_cast %24 : vector<1x128xi1> to vector<1x128xi1>
    %49 = vector.broadcast %48 : vector<1x128xi1> to vector<2x128xi1>
    %50 = vector.broadcast %cst_25 : f32 to vector<2x128xf32>
    %51 = arith.select %49, %47, %50 : vector<2x128xi1>, vector<2x128xf32>
    %cst_26 = arith.constant dense<0.000000e+00> : vector<2xf32>
    %52 = vector.multi_reduction <add>, %51, %cst_26 [1] : vector<2x128xf32> to vector<2xf32>
    %53 = vector.shape_cast %52 : vector<2xf32> to vector<2x1xf32>
    %cst_27 = arith.constant 1.000000e+00 : f32
    %54 = vector.broadcast %cst_27 : f32 to vector<2x1xf32>
    %55 = arith.divf %54, %53 : vector<2x1xf32>
    %56 = vector.broadcast %55 : vector<2x1xf32> to vector<2x128xf32>
    %57 = arith.mulf %47, %56 : vector<2x128xf32>
    %c0_28 = arith.constant 0 : index
    %c128 = arith.constant 128 : index
    %58 = vector.load %arg8[%c0_28, %c128] : memref<2x512xf32, #tpu.memory_space<vmem>>, vector<2x128xf32>
    tpu.vector_store %arg8[%c0_28, %c128], %57 {strides = array<i32>} : memref<2x512xf32, #tpu.memory_space<vmem>>, vector<2x128xf32>,
    %59 = vector.extract_strided_slice %21 {offsets = [0, 256], sizes = [2, 128], strides = [1, 1]} : vector<2x512xf32> to vector<2x128xf32>
    %cst_29 = arith.constant dense<0xFF800000> : vector<2xf32>
    %60 = vector.multi_reduction <maximumf>, %59, %cst_29 [1] : vector<2x128xf32> to vector<2xf32>
    %61 = vector.shape_cast %60 : vector<2xf32> to vector<2x1xf32>
    %62 = vector.broadcast %61 : vector<2x1xf32> to vector<2x128xf32>
    %63 = arith.subf %59, %62 : vector<2x128xf32>
    %64 = math.exp %63 : vector<2x128xf32>
    %cst_30 = arith.constant 0.000000e+00 : f32
    %65 = vector.shape_cast %24 : vector<1x128xi1> to vector<1x128xi1>
    %66 = vector.broadcast %65 : vector<1x128xi1> to vector<2x128xi1>
    %67 = vector.broadcast %cst_30 : f32 to vector<2x128xf32>
    %68 = arith.select %66, %64, %67 : vector<2x128xi1>, vector<2x128xf32>
    %cst_31 = arith.constant dense<0.000000e+00> : vector<2xf32>
    %69 = vector.multi_reduction <add>, %68, %cst_31 [1] : vector<2x128xf32> to vector<2xf32>
    %70 = vector.shape_cast %69 : vector<2xf32> to vector<2x1xf32>
    %cst_32 = arith.constant 1.000000e+00 : f32
    %71 = vector.broadcast %cst_32 : f32 to vector<2x1xf32>
    %72 = arith.divf %71, %70 : vector<2x1xf32>
    %73 = vector.broadcast %72 : vector<2x1xf32> to vector<2x128xf32>
    %74 = arith.mulf %64, %73 : vector<2x128xf32>
    %c0_33 = arith.constant 0 : index
    %c256 = arith.constant 256 : index
    %75 = vector.load %arg8[%c0_33, %c256] : memref<2x512xf32, #tpu.memory_space<vmem>>, vector<2x128xf32>
    tpu.vector_store %arg8[%c0_33, %c256], %74 {strides = array<i32>} : memref<2x512xf32, #tpu.memory_space<vmem>>, vector<2x128xf32>,
    %76 = vector.extract_strided_slice %21 {offsets = [0, 384], sizes = [2, 128], strides = [1, 1]} : vector<2x512xf32> to vector<2x128xf32>
    %cst_34 = arith.constant dense<0xFF800000> : vector<2xf32>
    %77 = vector.multi_reduction <maximumf>, %76, %cst_34 [1] : vector<2x128xf32> to vector<2xf32>
    %78 = vector.shape_cast %77 : vector<2xf32> to vector<2x1xf32>
    %79 = vector.broadcast %78 : vector<2x1xf32> to vector<2x128xf32>
    %80 = arith.subf %76, %79 : vector<2x128xf32>
    %81 = math.exp %80 : vector<2x128xf32>
    %cst_35 = arith.constant 0.000000e+00 : f32
    %82 = vector.shape_cast %24 : vector<1x128xi1> to vector<1x128xi1>
    %83 = vector.broadcast %82 : vector<1x128xi1> to vector<2x128xi1>
    %84 = vector.broadcast %cst_35 : f32 to vector<2x128xf32>
    %85 = arith.select %83, %81, %84 : vector<2x128xi1>, vector<2x128xf32>
    %cst_36 = arith.constant dense<0.000000e+00> : vector<2xf32>
    %86 = vector.multi_reduction <add>, %85, %cst_36 [1] : vector<2x128xf32> to vector<2xf32>
    %87 = vector.shape_cast %86 : vector<2xf32> to vector<2x1xf32>
    %cst_37 = arith.constant 1.000000e+00 : f32
    %88 = vector.broadcast %cst_37 : f32 to vector<2x1xf32>
    %89 = arith.divf %88, %87 : vector<2x1xf32>
    %90 = vector.broadcast %89 : vector<2x1xf32> to vector<2x128xf32>
    %91 = arith.mulf %81, %90 : vector<2x128xf32>
    %c0_38 = arith.constant 0 : index
    %c384 = arith.constant 384 : index
    %92 = vector.load %arg8[%c0_38, %c384] : memref<2x512xf32, #tpu.memory_space<vmem>>, vector<2x128xf32>
    tpu.vector_store %arg8[%c0_38, %c384], %91 {strides = array<i32>} : memref<2x512xf32, #tpu.memory_space<vmem>>, vector<2x128xf32>,
    return
  }
  func.func @transform_0(%arg0: i32) -> (i32, i32) {
    %c0_i32 = arith.constant 0 : i32
    %c0_i32_0 = arith.constant 0 : i32
    return %arg0, %c0_i32 : i32, i32
  }
  func.func @transform_1(%arg0: i32) -> (i32, i32) {
    %c0_i32 = arith.constant 0 : i32
    %c0_i32_0 = arith.constant 0 : i32
    %c0_i32_1 = arith.constant 0 : i32
    return %c0_i32, %c0_i32_0 : i32, i32
  }
  func.func @transform_2(%arg0: i32) -> (i32, i32) {
    %c0_i32 = arith.constant 0 : i32
    %c0_i32_0 = arith.constant 0 : i32
    %c0_i32_1 = arith.constant 0 : i32
    return %c0_i32, %c0_i32_0 : i32, i32
  }
  func.func @transform_3(%arg0: i32) -> (i32, i32) {
    %c0_i32 = arith.constant 0 : i32
    %c0_i32_0 = arith.constant 0 : i32
    %c0_i32_1 = arith.constant 0 : i32
    return %c0_i32, %c0_i32_0 : i32, i32
  }
  func.func @transform_4(%arg0: i32) -> (i32, i32) {
    %c0_i32 = arith.constant 0 : i32
    %c0_i32_0 = arith.constant 0 : i32
    %c0_i32_1 = arith.constant 0 : i32
    return %c0_i32, %c0_i32_0 : i32, i32
  }
  func.func @transform_5(%arg0: i32) -> (i32, i32) {
    %c0_i32 = arith.constant 0 : i32
    %c0_i32_0 = arith.constant 0 : i32
    %c0_i32_1 = arith.constant 0 : i32
    return %c0_i32, %c0_i32_0 : i32, i32
  }
  func.func @transform_6(%arg0: i32) -> (i32, i32) {
    %c0_i32 = arith.constant 0 : i32
    %c0_i32_0 = arith.constant 0 : i32
    %c0_i32_1 = arith.constant 0 : i32
    return %c0_i32, %c0_i32_0 : i32, i32
  }
  func.func @transform_7(%arg0: i32) -> (i32, i32) {
    %c0_i32 = arith.constant 0 : i32
    %c0_i32_0 = arith.constant 0 : i32
    return %arg0, %c0_i32 : i32, i32
  }
}

</mosaic_0001>

<bundles_post_ra>
// kernel: categorical_dqn_forward.1
= control target key start
LH: loop header
LB: loop body
LE: loop exit
PB: predicated region body
PF: predicated region fallthrough
CT: control target
= control target key end

     0   :  { %v509_v0 = vmov 0.0|0.0   ;;  %vm510_vm0 = vmmov 0   ;;  %v511_v3 = vmov 0.0   ;;  %vm36_vm1 = vcmask 130048   ;;  %s641_s1 = inlined_call_operand.vmem [shape: f32[16,8], index: 1, kind: input, shape index: {}]   ;;  %s642_s0 = inlined_call_operand.vmem [shape: f32[2,16], index: 0, kind: input, shape index: {}]   ;;  %s643_s3 = inlined_call_operand.vmem [shape: f32[8,32], index: 3, kind: input, shape index: {}]   ;;  %s644_s5 = inlined_call_operand.vmem [shape: f32[32,512], index: 5, kind: input, shape index: {}]   ;;  %s645_s2 = inlined_call_operand.vmem [shape: f32[1,8], index: 2, kind: input, shape index: {}]   ;;  %s646_s4 = inlined_call_operand.vmem [shape: f32[1,32], index: 4, kind: input, shape index: {}]   ;;  %s647_s6 = inlined_call_operand.vmem [shape: f32[1,512], index: 6, kind: input, shape index: {}]   ;;  %s648_s7 = inlined_call_operand.vmem [shape: f32[2,512], index: 7, kind: output, shape index: {}]  }
   0x1   :  { %471 = vmatprep.subr.bf16.mxu0 %v509_v0  ;;  %v27_v1 = vld [vmem:[%s641_s1] sm:$0xff]  ;;  %v28_v2 = vld [vmem:[%s641_s1 + $0x8] sm:$0xff]  ;;  %463 = vmatprep.mubr.msk.f32.mxu0 %vm510_vm0, %v511_v3  ;;  %v197_v9 = vld [vmem:[%s644_s5 + $0x18] sm:$0xff]  ;;  %vm119_vm2 = vcmask 64512   ;;  %vm232_vm3 = vcmask 261120   ;;  %v212_v41 = vlaneseq  ;;  %vm385_vm4 = vcmask 1041408  }
   0x2   :  { %v472_v4 = vpack.c.bf16 %v28_v2, %v27_v1  ;;  %466 = vmatprep.subr.mxu1 %v511_v3  ;;  %468 = vmatprep.mubr.msk.f32.mxu1 %vm510_vm0, %v511_v3  ;;  %v26_v5 = vld [vmem:[%s642_s0] sm:$0x3]  ;;  %v195_v7 = vld [vmem:[%s644_s5 + $0x8] sm:$0xff]  ;;  %v201_v11 = vld [vmem:[%s644_s5 + $0x38] sm:$0xff] }
   0x3   :  { %v111_v6 = vld [vmem:[%s643_s3] sm:$0xff]  ;;  %v199_v8 = vld [vmem:[%s644_s5 + $0x28] sm:$0xff]  ;;  %v482_v12 = vpack.c.bf16 %v201_v11, %v197_v9  ;;  %v196_v13 = vld [vmem:[%s644_s5 + $0x10] sm:$0xff]  ;;  %v213_v42 = vshrl.u32 %v212_v41, 7 }
   0x4   :  { %473 = vmatpush3.bf16.msra.mxu0 %v472_v4  ;;  %467 = vmatpush3.msra.mxu1 %v111_v6  ;;  %v474_v10 = vpack.c.bf16 %v199_v8, %v195_v7  ;;  %v200_v14 = vld [vmem:[%s644_s5 + $0x30] sm:$0xff]  ;;  %v448_v16 = vld [vmem:[%s645_s2] ss:$0 sm:$0xff]  ;;  %v203_v24 = vld [vmem:[%s644_s5 + $0x48] sm:$0xff] }
   0x5   :  { %v484_v15 = vpack.c.bf16 %v200_v14, %v196_v13  ;;  %483 = vmatprep.subr.bf16.mxu0 %v482_v12  ;;  %v194_v17 = vld [vmem:[%s644_s5] sm:$0xff]  ;;  %v207_v25 = vld [vmem:[%s644_s5 + $0x68] sm:$0xff]  ;;  %v205_v26 = vld [vmem:[%s644_s5 + $0x58] sm:$0xff]  ;;  %v214_v43 = vsub.s32 0, %v213_v42  ;;  %v222_v44 = vsub.s32 2, %v213_v42  ;;  %v218_v46 = vsub.s32 1, %v213_v42 }
   0x6   :  { %475 = vmatprep.subr.bf16.mxu1 %v474_v10  ;;  %v198_v18 = vld [vmem:[%s644_s5 + $0x20] sm:$0xff]  ;;  %v478_v27 = vpack.c.bf16 %v207_v25, %v203_v24  ;;  %v209_v28 = vld [vmem:[%s644_s5 + $0x78] sm:$0xff]  ;;  %v204_v33 = vld [vmem:[%s644_s5 + $0x50] sm:$0xff]  ;;  %v226_v47 = vsub.s32 3, %v213_v42 }
   0x7   :  { %464 = vmatmul.mubr.msk.f32.vlgmr.msra.gmra.mrb[0].mxu0 %vm36_vm1, %v26_v5  ;;  %v476_v22 = vpack.c.bf16 %v198_v18, %v194_v17  ;;  %v202_v29 = vld [vmem:[%s644_s5 + $0x40] sm:$0xff]  ;;  %v486_v31 = vpack.c.bf16 %v209_v28, %v205_v26  ;;  %v208_v34 = vld [vmem:[%s644_s5 + $0x70] sm:$0xff] }
   0x8   :  { %371 = vmatprep.mubr.f32.mxu0 %v511_v3  ;;  %485 = vmatpush1.bf16.msra.mxu0 %v484_v15  ;;  %v206_v30 = vld [vmem:[%s644_s5 + $0x60] sm:$0xff]  ;;  %v488_v35 = vpack.c.bf16 %v208_v34, %v204_v33 }
   0x9   :  { %v480_v32 = vpack.c.bf16 %v206_v30, %v202_v29  ;;  %487 = vmatprep.subr.bf16.mxu0 %v486_v31  ;;  %v450_v36 = vld [vmem:[%s646_s4] ss:$0 sm:$0xff] }
   0xa   :  { %v210_v45 = vld [vmem:[%s647_s6] sm:$0xf] }
   0xb   :  { %v215_v48 = vrot.slane %v210_v45, %v214_v43  ;;  %v223_v49 = vrot.slane %v210_v45, %v222_v44  ;;  %v219_v50 = vrot.slane %v210_v45, %v218_v46  ;;  %v227_v51 = vrot.slane %v210_v45, %v226_v47 }
   0xc   :  { %489 = vmatpush1.bf16.msra.mxu0 %v488_v35 }
  0xda   :  { %v106_v19 = vpop.f32.mrb[0].mxu0 }
  0xdb   :  { %v107_v20 = vadd.f32 %v448_v16, %v106_v19  ;;  %v465_v21 = vpop.f32.mrb[1].mxu0  ;;  %v383_v16 = vand.u32 127, %v212_v41 }
  0xdd   :  { %v110_v23 = vmax.f32 %v107_v20, 0.0  ;;  %vm384_vm5 = vcmp.lt.s32.totalorder %v383_v16, 8 }
  0xdf   :  { %469 = vmatmul.mubr.msk.f32.vlgmr.msra.gmra.mrb[0].mxu1 %vm119_vm2, %v110_v23 }
  0xe0   :  { %477 = vmatpush1.bf16.msra.mxu1 %v476_v22  ;;  %300 = vmatprep.mubr.f32.mxu1 %v511_v3 }
  0xe1   :  { %479 = vmatprep.subr.bf16.mxu1 %v478_v27 }
  0xe4   :  { %481 = vmatpush1.bf16.msra.mxu1 %v480_v32 }
 0x1b2   :  { %v189_v37 = vpop.f32.mrb[0].mxu1 }
 0x1b3   :  { %v190_v38 = vadd.f32 %v450_v36, %v189_v37  ;;  %v470_v39 = vpop.f32.mrb[1].mxu1 }
 0x1b5   :  { %v193_v40 = vmax.f32 %v190_v38, 0.0 }
 0x1b7   :  { %452 = vmatmul.mubr.msk.f32.vlgmr.msra.gmra.mrb[2].mxu1 %vm232_vm3, %v193_v40  ;;  %453 = vmatmul.mubr.msk.f32.vlgmr.msra.gmra.mrb[2].mxu0 %vm232_vm3, %v193_v40 }
 0x28a   :  { %v302_v52 = vpop.f32.mrb[2].mxu1  ;;  %v373_v53 = vpop.f32.mrb[2].mxu0 }
 0x28b   :  { %v303_v54 = vadd.f32 %v302_v52, %v215_v48  ;;  %v374_v55 = vadd.f32 %v373_v53, %v223_v49  ;;  %v304_v56 = vpop.f32.mrb[3].mxu1  ;;  %v375_v57 = vpop.f32.mrb[3].mxu0 }
 0x28c   :  { %v305_v58 = vadd.f32 %v304_v56, %v219_v50  ;;  %v376_v59 = vadd.f32 %v375_v57, %v227_v51 }
 0x28d   :  { %v378_v60 = vmax.f32 %v303_v54, 0.0  ;;  %v380_v61 = vmax.f32 %v374_v55, 0.0 }
 0x28e   :  { %v379_v62 = vmax.f32 %v305_v58, 0.0  ;;  %v381_v63 = vmax.f32 %v376_v59, 0.0 }
 0x28f   :  { %v386_v0 = vsel %vm385_vm4, %v378_v60, -inf  ;;  %v416_v1 = vsel %vm385_vm4, %v380_v61, -inf }
 0x290   :  { %387 = vmax.xlane.f32.xlu0 %v386_v0  ;;  %417 = vmax.xlane.f32.xlu1 %v416_v1  ;;  %v402_v2 = vsel %vm385_vm4, %v379_v62, -inf  ;;  %v430_v3 = vsel %vm385_vm4, %v381_v63, -inf }
 0x294   :  { %403 = vmax.xlane.f32.xlu0 %v402_v2  ;;  %431 = vmax.xlane.f32.xlu1 %v430_v3 }
 0x31d   :  { %v388_v4 = vpop.xlane.xlu0 %387  ;;  %v418_v5 = vpop.xlane.xlu1 %417 }
 0x31e   :  { %v389_v6 = vsub.f32 %v378_v60, %v388_v4  ;;  %v419_v7 = vsub.f32 %v380_v61, %v418_v5 }
 0x320   :  { %v390_v8 = vmul.f32 1.442695, %v389_v6  ;;  %v420_v9 = vmul.f32 1.442695, %v419_v7 }
 0x321   :  { %v404_v10 = vpop.xlane.xlu0 %403  ;;  %v432_v11 = vpop.xlane.xlu1 %431 }
 0x322   :  { %493 = vpow2.f32 %v390_v8  ;;  %v405_v12 = vsub.f32 %v379_v62, %v404_v10  ;;  %v433_v13 = vsub.f32 %v381_v63, %v432_v11 }
 0x323   :  { %495 = vpow2.f32 %v420_v9 }
 0x324   :  { %v406_v14 = vmul.f32 1.442695, %v405_v12  ;;  %v434_v15 = vmul.f32 1.442695, %v433_v13 }
 0x326   :  { %497 = vpow2.f32 %v406_v14 }
 0x327   :  { %499 = vpow2.f32 %v434_v15 }
 0x32c   :  { %v494_v17 = vpop.eup %493 }
 0x32d   :  { %v496_v18 = vpop.eup %495  ;;  %v394_v19 = vsel %vm384_vm5, %v494_v17, 0.0 }
 0x32e   :  { %v395_v20 = vsel %vm385_vm4, %v394_v19, 0.0  ;;  %v422_v21 = vsel %vm384_vm5, %v496_v18, 0.0 }
 0x32f   :  { %396 = vadd.xlane.f32.xlu0 %v395_v20  ;;  %v423_v26 = vsel %vm385_vm4, %v422_v21, 0.0 }
 0x330   :  { %v498_v22 = vpop.eup %497 }
 0x331   :  { %v500_v23 = vpop.eup %499  ;;  %v408_v24 = vsel %vm384_vm5, %v498_v22, 0.0 }
 0x332   :  { %v409_v25 = vsel %vm385_vm4, %v408_v24, 0.0  ;;  %v436_v27 = vsel %vm384_vm5, %v500_v23, 0.0 }
 0x333   :  { %410 = vadd.xlane.f32.xlu1 %v409_v25  ;;  %424 = vadd.xlane.f32.xlu0 %v423_v26  ;;  %v437_v28 = vsel %vm385_vm4, %v436_v27, 0.0 }
 0x337   :  { %438 = vadd.xlane.f32.xlu1 %v437_v28 }
 0x3bc   :  { %v397_v29 = vpop.xlane.xlu0 %396 }
 0x3bd   :  { %501 = vrcp.f32 %v397_v29 }
 0x3c0   :  { %v425_v30 = vpop.xlane.xlu0 %424  ;;  %v411_v31 = vpop.xlane.xlu1 %410 }
 0x3c1   :  { %503 = vrcp.f32 %v425_v30 }
 0x3c2   :  { %505 = vrcp.f32 %v411_v31 }
 0x3c4   :  { %v439_v32 = vpop.xlane.xlu1 %438 }
 0x3c5   :  { %507 = vrcp.f32 %v439_v32 }
 0x3c7   :  { %v502_v33 = vpop.eup %501 }
 0x3c8   :  { %v400_v34 = vmul.f32 %v502_v33, %v494_v17 }
 0x3ca   :  { %401 = vst [vmem:[%s648_s7] sm:$0x3] %v400_v34 }
 0x3cb   :  { %v504_v35 = vpop.eup %503 }
 0x3cc   :  { %v506_v36 = vpop.eup %505  ;;  %v428_v37 = vmul.f32 %v504_v35, %v496_v18 }
 0x3cd   :  { %v414_v38 = vmul.f32 %v506_v36, %v498_v22 }
 0x3ce   :  { %429 = vst [vmem:[%s648_s7 + $0x4] sm:$0x3] %v428_v37 }
 0x3cf   :  { %v508_v39 = vpop.eup %507  ;;  %415 = vst [vmem:[%s648_s7 + $0x2] sm:$0x3] %v414_v38 }
 0x3d0   :  { %v442_v40 = vmul.f32 %v508_v39, %v500_v23 }
 0x3d2   :  { %443 = vst [vmem:[%s648_s7 + $0x6] sm:$0x3] %v442_v40 }

</bundles_post_ra>
